<compile_context>
chip_gen: v7x
topology: tpu7x:2x2x1
jax: 0.10.0
libtpu: 0.0.40
codegen_flags: <defaults>
</compile_context>

<pallas_src>
import functools

import jax
import jax.numpy as jnp
from jax import lax
from jax.experimental import pallas as pl
from jax.experimental.pallas import tpu as pltpu

LANES = 128      # TPU lane width; fused hidden (2*H+1) and A+1 must fit in 128 lanes.
OUT_LANES = 8    # narrow lane-padded output: lane0=logp, lane1=value, lane2=entropy.


def _round_up(x, m):
    return (x + m - 1) // m * m


# --------------------------------------------------------------------------
# Weight packing (runs once in the wrapper, outside the kernel)
# --------------------------------------------------------------------------
def pack_weight_slab(params, state_dim, action_dim, n_latent_var,
                     dtype=jnp.bfloat16):
    """Pack actor+critic weights/biases into one (rows, 128) slab.

    Input-row layout of the streamed x: [state(S) | action(1) | 1.0 | pad].
    Hidden lane layout: actor lanes [0,H), critic lanes [H,2H), "ones" lane 2H.
    Output lane layout: logits lanes [0,A), value lane A, rest zero.
    """
    S, A, H = state_dim, action_dim, n_latent_var
    assert 2 * H + 1 <= LANES, "fused hidden (2*H + ones lane) must fit in 128 lanes"
    assert A + 1 <= LANES, "action_dim + 1 must fit in 128 lanes"

    in_cols = _round_up(S + 2, 16)      # 16-row alignment keeps bf16 slices tile-aligned
    off_w1, off_w2, off_w3 = 0, in_cols, in_cols + LANES
    rows = in_cols + 2 * LANES

    slab = jnp.zeros((rows, LANES), jnp.float32)
    # layer 1: x(S) -> [actor H | critic H]; bias on the "ones" input row (S+1).
    slab = slab.at[off_w1:off_w1 + S, 0:H].set(params["w1a"])
    slab = slab.at[off_w1:off_w1 + S, H:2 * H].set(params["w1v"])
    slab = slab.at[off_w1 + S + 1, 0:H].set(params["b1a"][0])
    slab = slab.at[off_w1 + S + 1, H:2 * H].set(params["b1v"][0])
    # layer 2: block-diagonal [w2a 0; 0 w2v]; bias on the ones-lane row (2H).
    slab = slab.at[off_w2:off_w2 + H, 0:H].set(params["w2a"])
    slab = slab.at[off_w2 + H:off_w2 + 2 * H, H:2 * H].set(params["w2v"])
    slab = slab.at[off_w2 + 2 * H, 0:H].set(params["b2a"][0])
    slab = slab.at[off_w2 + 2 * H, H:2 * H].set(params["b2v"][0])
    # layer 3: actor logits -> lanes [0,A); critic value -> lane A; bias row 2H.
    slab = slab.at[off_w3:off_w3 + H, 0:A].set(params["w3a"])
    slab = slab.at[off_w3 + H:off_w3 + 2 * H, A:A + 1].set(params["w3v"])
    slab = slab.at[off_w3 + 2 * H, 0:A].set(params["b3a"][0])
    slab = slab.at[off_w3 + 2 * H, A].set(params["b3v"][0, 0])

    layout = dict(in_cols=in_cols, off_w1=off_w1, off_w2=off_w2,
                  off_w3=off_w3, rows=rows)
    return slab.astype(dtype), layout


# --------------------------------------------------------------------------
# Kernel
# --------------------------------------------------------------------------
def _fused_actor_critic_kernel(x_ref, w_ref, out_ref, *,
                               S, A, H, in_cols, off_w1, off_w2, off_w3):
    mm = w_ref.dtype                       # matmul operand dtype (f32 or bf16)
    ones_lane = 2 * H                      # lane that carries the constant 1.0

    x = x_ref[...]                         # (TB, in_cols) mm-dtype: [state|action|1|pad]
    act = x[:, S:S + 1].astype(jnp.int32)  # exact for small integer action indices

    # ---- fused actor+critic MLP: 3 lane-packed 128-wide matmuls (MXU) ----
    h = jnp.tanh(jnp.dot(x, w_ref[off_w1:off_w1 + in_cols, :],
                         preferred_element_type=jnp.float32))          # (TB,128) f32
    col = lax.broadcasted_iota(jnp.int32, h.shape, 1)                  # (TB,128)
    h = jnp.where(col == ones_lane, 1.0, h)                            # re-arm bias lane

    h = jnp.tanh(jnp.dot(h.astype(mm), w_ref[off_w2:off_w2 + LANES, :],
                         preferred_element_type=jnp.float32))
    h = jnp.where(col == ones_lane, 1.0, h)

    out3 = jnp.dot(h.astype(mm), w_ref[off_w3:off_w3 + LANES, :],
                   preferred_element_type=jnp.float32)                 # (TB,128)

    # ---- softmax / Categorical statistics (all f32, padded lanes masked) ----
    valid = col < A
    logits = jnp.where(valid, out3, jnp.float32(-1e30))   # finite sentinel keeps e*z == 0
    m = jnp.max(logits, axis=-1, keepdims=True)
    z = logits - m
    e = jnp.where(valid, jnp.exp(z), 0.0)
    denom = jnp.sum(e, axis=-1, keepdims=True)
    log_denom = jnp.log(denom)

    # Categorical.log_prob(action): action was packed as column S of x.
    z_a = jnp.sum(jnp.where(col == act, z, 0.0), axis=-1, keepdims=True)
    logp = z_a - log_denom

    # Categorical.entropy() = log(denom) - sum(e*z)/denom  (== -sum p*log p)
    sum_ez = jnp.sum(e * z, axis=-1, keepdims=True)
    ent = log_denom - sum_ez / denom   # exact divide keeps 1e-5 tolerance on the f32 path

    # critic value lives in lane A of out3
    val = jnp.sum(jnp.where(col == A, out3, 0.0), axis=-1, keepdims=True)

    # narrow lane-dense output via direct slice stores (no lane broadcasts)
    out_ref[:, 0:1] = logp
    out_ref[:, 1:2] = val
    out_ref[:, 2:3] = ent
    out_ref[:, 3:OUT_LANES] = jnp.zeros((logp.shape[0], OUT_LANES - 3), jnp.float32)


# --------------------------------------------------------------------------
# Wrapper
# --------------------------------------------------------------------------
def actor_critic_evaluate(state, action, params, *,
                          matmul_dtype=jnp.bfloat16, block_b=None):
    """Pallas equivalent of ActorCritic.evaluate(state, action).

    Returns (action_logprobs (B,), state_value (B,), dist_entropy (B,)).
    matmul_dtype=bfloat16 (default): bf16 MXU operands, f32 accumulation,
    f32 elementwise math. matmul_dtype=float32: exact path (1e-5 tolerance).
    """
    B, S = state.shape
    H = params["w1a"].shape[1]
    A = params["w3a"].shape[1]
    if matmul_dtype == jnp.bfloat16:
        assert A <= 256, "bf16-packed action column is exact only for action_dim <= 256"

    slab, layout = pack_weight_slab(params, S, A, H, dtype=matmul_dtype)
    in_cols = layout["in_cols"]

    # Batch tile: big enough to amortize the ~0.35us per-grid-step overhead,
    # small enough that double-buffered blocks are tiny even in v7x's 64 MiB
    # VMEM; sized so the grid has >=2 steps when possible (v7x megacore).
    CAP = 2048
    if block_b is None:
        half = _round_up(max(16, (_round_up(B, 16) + 1) // 2), 16)
        block_b = min(CAP, half)
    TB = max(16, _round_up(block_b, 16))   # multiple of 16: bf16 sublane-tile safe
    B_pad = _round_up(B, TB)

    # packed streamed input (built directly in the matmul dtype):
    # [state | action | 1.0 | zero-pad], zero-padded rows beyond B.
    x = jnp.zeros((B_pad, in_cols), matmul_dtype)
    x = x.at[:B, :S].set(state.astype(matmul_dtype))
    x = x.at[:B, S].set(action.astype(matmul_dtype))
    x = x.at[:, S + 1].set(1.0)            # bias ("ones") column

    kernel = functools.partial(
        _fused_actor_critic_kernel,
        S=S, A=A, H=H, in_cols=in_cols,
        off_w1=layout["off_w1"], off_w2=layout["off_w2"], off_w3=layout["off_w3"],
    )

    x_bytes = B_pad * in_cols * x.dtype.itemsize
    w_bytes = slab.size * slab.dtype.itemsize
    o_bytes = B_pad * OUT_LANES * 4
    cost = pl.CostEstimate(
        flops=2 * B_pad * (in_cols + 2 * LANES) * LANES,
        transcendentals=3 * B_pad * LANES,
        bytes_accessed=x_bytes + w_bytes + o_bytes,
    )

    out = pl.pallas_call(
        kernel,
        out_shape=jax.ShapeDtypeStruct((B_pad, OUT_LANES), jnp.float32),
        grid_spec=pltpu.PrefetchScalarGridSpec(
            num_scalar_prefetch=0,
            grid=(B_pad // TB,),
            in_specs=[
                pl.BlockSpec((TB, in_cols), lambda i: (i, 0)),            # streamed batch
                pl.BlockSpec((layout["rows"], LANES), lambda i: (0, 0)),  # resident weights
            ],
            out_specs=pl.BlockSpec((TB, OUT_LANES), lambda i: (i, 0)),
        ),
        compiler_params=pltpu.CompilerParams(
            dimension_semantics=("parallel",),   # shard batch tiles across TCs (v7x)
        ),
        cost_estimate=cost,
    )(x, slab)

    return out[:B, 0], out[:B, 1], out[:B, 2]


# --------------------------------------------------------------------------
# Param init + pure-JAX reference (for the self-check)
# --------------------------------------------------------------------------
def init_params(key, state_dim, action_dim, n_latent_var):
    """Deterministic synthetic init (PyTorch-Linear-like uniform fan-in scaling).

    Weights stored as (in_features, out_features); biases as (1, out_features).
    """
    keys = jax.random.split(key, 12)

    def lin(kw, kb, fan_in, fan_out):
        bound = 1.0 / jnp.sqrt(jnp.float32(fan_in))
        w = jax.random.uniform(kw, (fan_in, fan_out), jnp.float32, -bound, bound)
        b = jax.random.uniform(kb, (1, fan_out), jnp.float32, -bound, bound)
        return w, b

    w1a, b1a = lin(keys[0], keys[1], state_dim, n_latent_var)
    w2a, b2a = lin(keys[2], keys[3], n_latent_var, n_latent_var)
    w3a, b3a = lin(keys[4], keys[5], n_latent_var, action_dim)
    w1v, b1v = lin(keys[6], keys[7], state_dim, n_latent_var)
    w2v, b2v = lin(keys[8], keys[9], n_latent_var, n_latent_var)
    w3v, b3v = lin(keys[10], keys[11], n_latent_var, 1)
    return dict(
        w1a=w1a, b1a=b1a, w2a=w2a, b2a=b2a, w3a=w3a, b3a=b3a,
        w1v=w1v, b1v=b1v, w2v=w2v, b2v=b2v, w3v=w3v, b3v=b3v,
    )


def _reference_evaluate(state, action, p):
    h = jnp.tanh(state @ p["w1a"] + p["b1a"])
    h = jnp.tanh(h @ p["w2a"] + p["b2a"])
    logits = h @ p["w3a"] + p["b3a"]
    logp_all = jax.nn.log_softmax(logits, axis=-1)
    probs = jnp.exp(logp_all)
    logp = jnp.take_along_axis(logp_all, action[:, None].astype(jnp.int32), axis=-1)[:, 0]
    ent = -jnp.sum(probs * logp_all, axis=-1)
    hv = jnp.tanh(state @ p["w1v"] + p["b1v"])
    hv = jnp.tanh(hv @ p["w2v"] + p["b2v"])
    val = (hv @ p["w3v"] + p["b3v"])[:, 0]
    return logp, val, ent


# TODO(synk): ActorCritic.act() / forward() (Categorical sampling + Memory
# bookkeeping) are host-side / stateful paths and are not implemented as a
# kernel; only evaluate() is.

if __name__ == "__main__":
    STATE_DIM = 4      # state_dim
    ACTION_DIM = 4     # action_dim
    N_LATENT = 32      # n_latent_var
    BATCH = 8

    key = jax.random.PRNGKey(0)
    k_params, k_state, k_action = jax.random.split(key, 3)

    params = init_params(k_params, STATE_DIM, ACTION_DIM, N_LATENT)
    state = jax.random.normal(k_state, (BATCH, STATE_DIM), jnp.float32)
    action = jax.random.randint(k_action, (BATCH,), 0, ACTION_DIM, jnp.int32)

    ref_logp, ref_val, ref_ent = _reference_evaluate(state, action, params)

    # exact f32 MXU path (tight tolerance)
    logp, value, entropy = actor_critic_evaluate(
        state, action, params, matmul_dtype=jnp.float32)
    jax.block_until_ready((logp, value, entropy))
    assert jnp.allclose(logp, ref_logp, atol=1e-5), "logprob mismatch (f32)"
    assert jnp.allclose(value, ref_val, atol=1e-5), "value mismatch (f32)"
    assert jnp.allclose(entropy, ref_ent, atol=1e-5), "entropy mismatch (f32)"

    # default bf16-operand MXU path (f32 accumulation + f32 elementwise math)
    logp16, val16, ent16 = actor_critic_evaluate(state, action, params)
    jax.block_until_ready((logp16, val16, ent16))
    assert jnp.allclose(logp16, ref_logp, atol=1e-1), "logprob mismatch (bf16)"
    assert jnp.allclose(val16, ref_val, atol=1e-1), "value mismatch (bf16)"
    assert jnp.allclose(ent16, ref_ent, atol=1e-1), "entropy mismatch (bf16)"

    # larger batch exercising a multi-step grid + padding/slicing (f32 exact)
    B2 = 100
    k_state2, k_action2 = jax.random.split(jax.random.PRNGKey(1), 2)
    state2 = jax.random.normal(k_state2, (B2, STATE_DIM), jnp.float32)
    action2 = jax.random.randint(k_action2, (B2,), 0, ACTION_DIM, jnp.int32)
    lp2, v2, e2 = actor_critic_evaluate(state2, action2, params,
                                        matmul_dtype=jnp.float32)
    jax.block_until_ready((lp2, v2, e2))
    rlp2, rv2, re2 = _reference_evaluate(state2, action2, params)
    assert jnp.allclose(lp2, rlp2, atol=1e-5), "logprob mismatch (multi-tile)"
    assert jnp.allclose(v2, rv2, atol=1e-5), "value mismatch (multi-tile)"
    assert jnp.allclose(e2, re2, atol=1e-5), "entropy mismatch (multi-tile)"

    print("KERNEL_OK")
</pallas_src>

<mosaic_0001>
module attributes {stable_mosaic.version = 11 : i64} {
  func.func @_fused_actor_critic_kernel(%arg0: i32, %arg1: memref<16x16xf32, #tpu.memory_space<vmem>>, %arg2: memref<272x128xf32, #tpu.memory_space<vmem>>, %arg3: memref<16x8xf32, #tpu.memory_space<vmem>>) attributes {dimension_semantics = [#tpu.dimension_semantics<parallel>], iteration_bounds = array<i64: 1>, scalar_prefetch = 0 : i64, scratch_operands = 0 : i64, tpu.core_type = #tpu.core_type<tc>, window_params = [{transform_indices = @transform_0, window_bounds = array<i64: 16, 16>}, {pipeline_mode = #tpu.pipeline_mode<synchronous>, transform_indices = @transform_1, window_bounds = array<i64: 272, 128>}, {transform_indices = @transform_2, window_bounds = array<i64: 16, 8>}]} {
    %c0 = arith.constant 0 : index
    %c0_0 = arith.constant 0 : index
    %0 = vector.load %arg1[%c0, %c0_0] : memref<16x16xf32, #tpu.memory_space<vmem>>, vector<16x16xf32>
    %1 = vector.extract_strided_slice %0 {offsets = [0, 4], sizes = [16, 1], strides = [1, 1]} : vector<16x16xf32> to vector<16x1xf32>
    %2 = arith.fptosi %1 : vector<16x1xf32> to vector<16x1xi32>
    %c0_1 = arith.constant 0 : index
    %c0_2 = arith.constant 0 : index
    %3 = vector.load %arg2[%c0_1, %c0_2] : memref<272x128xf32, #tpu.memory_space<vmem>>, vector<16x128xf32>
    %cst = arith.constant dense<0.000000e+00> : vector<16x128xf32>
    %4 = tpu.matmul %0, %3, %cst {dimension_numbers = #tpu.dot_dimension_numbers<[1], [0], [0], [1], [0, 0, 1, 1], [], []>} : vector<16x16xf32>, vector<16x128xf32>, vector<16x128xf32> -> vector<16x128xf32>
    %5 = math.tanh %4 : vector<16x128xf32>
    %6 = tpu.iota {dimensions = array<i32: 1>} : vector<16x128xi32>
    %c64_i32 = arith.constant 64 : i32
    %7 = vector.broadcast %c64_i32 : i32 to vector<16x128xi32>
    %8 = arith.cmpi eq, %6, %7 : vector<16x128xi32>
    %cst_3 = arith.constant 1.000000e+00 : f32
    %9 = vector.broadcast %cst_3 : f32 to vector<16x128xf32>
    %10 = arith.select %8, %9, %5 : vector<16x128xi1>, vector<16x128xf32>
    %c16 = arith.constant 16 : index
    %c0_4 = arith.constant 0 : index
    %11 = vector.load %arg2[%c16, %c0_4] : memref<272x128xf32, #tpu.memory_space<vmem>>, vector<128x128xf32>
    %cst_5 = arith.constant dense<0.000000e+00> : vector<16x128xf32>
    %12 = tpu.matmul %10, %11, %cst_5 {dimension_numbers = #tpu.dot_dimension_numbers<[1], [0], [0], [1], [0, 0, 1, 1], [], []>} : vector<16x128xf32>, vector<128x128xf32>, vector<16x128xf32> -> vector<16x128xf32>
    %13 = math.tanh %12 : vector<16x128xf32>
    %c64_i32_6 = arith.constant 64 : i32
    %14 = vector.broadcast %c64_i32_6 : i32 to vector<16x128xi32>
    %15 = arith.cmpi eq, %6, %14 : vector<16x128xi32>
    %cst_7 = arith.constant 1.000000e+00 : f32
    %16 = vector.broadcast %cst_7 : f32 to vector<16x128xf32>
    %17 = arith.select %15, %16, %13 : vector<16x128xi1>, vector<16x128xf32>
    %c144 = arith.constant 144 : index
    %c0_8 = arith.constant 0 : index
    %18 = vector.load %arg2[%c144, %c0_8] : memref<272x128xf32, #tpu.memory_space<vmem>>, vector<128x128xf32>
    %cst_9 = arith.constant dense<0.000000e+00> : vector<16x128xf32>
    %19 = tpu.matmul %17, %18, %cst_9 {dimension_numbers = #tpu.dot_dimension_numbers<[1], [0], [0], [1], [0, 0, 1, 1], [], []>} : vector<16x128xf32>, vector<128x128xf32>, vector<16x128xf32> -> vector<16x128xf32>
    %c4_i32 = arith.constant 4 : i32
    %20 = vector.broadcast %c4_i32 : i32 to vector<16x128xi32>
    %21 = arith.cmpi slt, %6, %20 : vector<16x128xi32>
    %cst_10 = arith.constant -1.000000e+30 : f32
    %22 = vector.broadcast %cst_10 : f32 to vector<16x128xf32>
    %23 = arith.select %21, %19, %22 : vector<16x128xi1>, vector<16x128xf32>
    %cst_11 = arith.constant dense<0xFF800000> : vector<16xf32>
    %24 = vector.multi_reduction <maximumf>, %23, %cst_11 [1] : vector<16x128xf32> to vector<16xf32>
    %25 = vector.shape_cast %24 : vector<16xf32> to vector<16x1xf32>
    %26 = vector.broadcast %25 : vector<16x1xf32> to vector<16x128xf32>
    %27 = arith.subf %23, %26 : vector<16x128xf32>
    %28 = math.exp %27 : vector<16x128xf32>
    %cst_12 = arith.constant 0.000000e+00 : f32
    %29 = vector.broadcast %cst_12 : f32 to vector<16x128xf32>
    %30 = arith.select %21, %28, %29 : vector<16x128xi1>, vector<16x128xf32>
    %cst_13 = arith.constant dense<0.000000e+00> : vector<16xf32>
    %31 = vector.multi_reduction <add>, %30, %cst_13 [1] : vector<16x128xf32> to vector<16xf32>
    %32 = vector.shape_cast %31 : vector<16xf32> to vector<16x1xf32>
    %33 = math.log %32 : vector<16x1xf32>
    %34 = vector.broadcast %2 : vector<16x1xi32> to vector<16x128xi32>
    %35 = arith.cmpi eq, %6, %34 : vector<16x128xi32>
    %cst_14 = arith.constant 0.000000e+00 : f32
    %36 = vector.broadcast %cst_14 : f32 to vector<16x128xf32>
    %37 = arith.select %35, %27, %36 : vector<16x128xi1>, vector<16x128xf32>
    %cst_15 = arith.constant dense<0.000000e+00> : vector<16xf32>
    %38 = vector.multi_reduction <add>, %37, %cst_15 [1] : vector<16x128xf32> to vector<16xf32>
    %39 = vector.shape_cast %38 : vector<16xf32> to vector<16x1xf32>
    %40 = arith.subf %39, %33 : vector<16x1xf32>
    %41 = arith.mulf %30, %27 : vector<16x128xf32>
    %cst_16 = arith.constant dense<0.000000e+00> : vector<16xf32>
    %42 = vector.multi_reduction <add>, %41, %cst_16 [1] : vector<16x128xf32> to vector<16xf32>
    %43 = vector.shape_cast %42 : vector<16xf32> to vector<16x1xf32>
    %44 = arith.divf %43, %32 : vector<16x1xf32>
    %45 = arith.subf %33, %44 : vector<16x1xf32>
    %c4_i32_17 = arith.constant 4 : i32
    %46 = vector.broadcast %c4_i32_17 : i32 to vector<16x128xi32>
    %47 = arith.cmpi eq, %6, %46 : vector<16x128xi32>
    %cst_18 = arith.constant 0.000000e+00 : f32
    %48 = vector.broadcast %cst_18 : f32 to vector<16x128xf32>
    %49 = arith.select %47, %19, %48 : vector<16x128xi1>, vector<16x128xf32>
    %cst_19 = arith.constant dense<0.000000e+00> : vector<16xf32>
    %50 = vector.multi_reduction <add>, %49, %cst_19 [1] : vector<16x128xf32> to vector<16xf32>
    %51 = vector.shape_cast %50 : vector<16xf32> to vector<16x1xf32>
    %c0_20 = arith.constant 0 : index
    %c0_21 = arith.constant 0 : index
    %52 = vector.load %arg3[%c0_20, %c0_21] : memref<16x8xf32, #tpu.memory_space<vmem>>, vector<16x1xf32>
    tpu.vector_store %arg3[%c0_20, %c0_21], %40 {strides = array<i32>} : memref<16x8xf32, #tpu.memory_space<vmem>>, vector<16x1xf32>,
    %c0_22 = arith.constant 0 : index
    %c1 = arith.constant 1 : index
    %53 = vector.load %arg3[%c0_22, %c1] : memref<16x8xf32, #tpu.memory_space<vmem>>, vector<16x1xf32>
    tpu.vector_store %arg3[%c0_22, %c1], %51 {strides = array<i32>} : memref<16x8xf32, #tpu.memory_space<vmem>>, vector<16x1xf32>,
    %c0_23 = arith.constant 0 : index
    %c2 = arith.constant 2 : index
    %54 = vector.load %arg3[%c0_23, %c2] : memref<16x8xf32, #tpu.memory_space<vmem>>, vector<16x1xf32>
    tpu.vector_store %arg3[%c0_23, %c2], %45 {strides = array<i32>} : memref<16x8xf32, #tpu.memory_space<vmem>>, vector<16x1xf32>,
    %cst_24 = arith.constant 0.000000e+00 : f32
    %55 = vector.broadcast %cst_24 : f32 to vector<16x5xf32>
    %c0_25 = arith.constant 0 : index
    %c3 = arith.constant 3 : index
    %56 = vector.load %arg3[%c0_25, %c3] : memref<16x8xf32, #tpu.memory_space<vmem>>, vector<16x5xf32>
    tpu.vector_store %arg3[%c0_25, %c3], %55 {strides = array<i32>} : memref<16x8xf32, #tpu.memory_space<vmem>>, vector<16x5xf32>,
    return
  }
  func.func @transform_0(%arg0: i32) -> (i32, i32) {
    %c0_i32 = arith.constant 0 : i32
    %c0_i32_0 = arith.constant 0 : i32
    return %arg0, %c0_i32 : i32, i32
  }
  func.func @transform_1(%arg0: i32) -> (i32, i32) {
    %c0_i32 = arith.constant 0 : i32
    %c0_i32_0 = arith.constant 0 : i32
    %c0_i32_1 = arith.constant 0 : i32
    return %c0_i32, %c0_i32_0 : i32, i32
  }
  func.func @transform_2(%arg0: i32) -> (i32, i32) {
    %c0_i32 = arith.constant 0 : i32
    %c0_i32_0 = arith.constant 0 : i32
    return %arg0, %c0_i32 : i32, i32
  }
}

</mosaic_0001>

<bundles_post_ra>
// kernel: tpu_custom_call.1
= control target key start
LH: loop header
LB: loop body
LE: loop exit
PB: predicated region body
PF: predicated region fallthrough
CT: control target
= control target key end

     0   :  { %7 = vsyncpa [#allocation3], 0  ;;  %s771_s0 = inlined_call_operand.hbm [shape: f32[16,16], index: 0, kind: input, shape index: {}]   ;;  %s772_s1 = inlined_call_operand.hbm [shape: f32[272,128], index: 1, kind: input, shape index: {}]   ;;  %s773_s2 = inlined_call_operand.vmem [shape: f32[16,8], index: 2, kind: output, shape index: {}]  }
   0x1   :  { %8 = vsyncpa [#allocation5], 0  ;;  %s663_s9 = smov [#allocation2]   ;;  %s615_s13 = scalar_lea.hbm %s771_s0, 256 }
   0x2   :  { %s14_s10 = sshll.u32 %s663_s9, 4  ;;  %p616_p0 = scmp.ne.s32.totalorder %s771_s0, %s615_s13  ;;  %s15_s10 = int_to_ptr.vmem [resolvable:$true] %s14_s10 }
   0x3   :  { %p619_p1 = scmp.lt.u32.totalorder %s615_s13, %s771_s0 }
   0x5   :  { %p621_p2 = pnand %p619_p1, %p616_p0 }
   0x7   :  { %624 = shalt.err (!%p621_p2)
}
   0x8   :  { %s625_s18 = scalar_lea.vmem %s15_s10, 256  ;;  %p630_p4 = scmp.lt.s32.totalorder %s15_s10, %s15_s10 }
   0x9   :  { %p626_p3 = scmp.ne.s32.totalorder %s15_s10, %s625_s18  ;;  %p631_p5 = scmp.lt.s32.totalorder %s625_s18, %s625_s18 }
   0xb   :  { %p632_p6 = por %p631_p5, %p630_p4 }
   0xd   :  { %p633_p7 = pnand %p632_p6, %p626_p3 }
   0xf   :  { %636 = shalt.err (!%p633_p7)
}
  0x10   :  { %s664_s19 = smov 128   ;;  %s665_s20 = smov 8  }
  0x11   :  { %20 = dma.hbm_to_vmem [thread:$0]  %s771_s0, 256, %s15_s10, [#allocation3], %s664_s19, %s664_s19, %s665_s20  }
  0x12   :  { %s666_s23 = smov [#allocation4]   ;;  %s637_s27 = scalar_lea.hbm %s772_s1, 4352 }
  0x13   :  { %s26_s24 = sshll.u32 %s666_s23, 4  ;;  %p638_p8 = scmp.ne.s32.totalorder %s772_s1, %s637_s27  ;;  %s27_s24 = int_to_ptr.vmem [resolvable:$true] %s26_s24 }
  0x14   :  { %p641_p9 = scmp.lt.u32.totalorder %s637_s27, %s772_s1 }
  0x16   :  { %p643_p10 = pnand %p641_p9, %p638_p8 }
  0x18   :  { %646 = shalt.err (!%p643_p10)
}
  0x19   :  { %s647_s4 = scalar_lea.vmem %s27_s24, 4352  ;;  %p652_p12 = scmp.lt.s32.totalorder %s27_s24, %s27_s24 }
  0x1a   :  { %p648_p11 = scmp.ne.s32.totalorder %s27_s24, %s647_s4  ;;  %p653_p13 = scmp.lt.s32.totalorder %s647_s4, %s647_s4 }
  0x1c   :  { %p654_p0 = por %p653_p13, %p652_p12 }
  0x1e   :  { %p655_p1 = pnand %p654_p0, %p648_p11 }
  0x20   :  { %658 = shalt.err (!%p655_p1)
}
  0x21   :  { %32 = dma.hbm_to_vmem [thread:$0]  %s772_s1, 4352, %s27_s24, [#allocation5], %s664_s19, %s664_s19, %s665_s20  }
  0x22   :  { %659 = dma.done.wait [#allocation3], 256  }
  0x23   :  { %660 = vsyncadd [#allocation3], 4294967040 }
  0x24   :  { %661 = dma.done.wait [#allocation5], 4352  }
  0x25   :  { %662 = vsyncadd [#allocation5], 4294962944  ;;  %vm45_vm0 = vcmask 130048   ;;  %v43_v0 = vld [vmem:[#allocation4] sm:$0xff]  ;;  %v44_v1 = vld [vmem:[#allocation4 + $0x8] sm:$0xff]  ;;  %v129_v46 = vlaneseq  ;;  %vm378_vm6 = vcmask 7168  }
  0x26   :  { %v708_v2 = vld [vmem:[#allocation2] sm:$0xff]  ;;  %v515_v3 = vpack.c.bf16 %v44_v1, %v43_v0  ;;  %v135_v5 = vld [vmem:[#allocation4 + $0x18] sm:$0xff]  ;;  %v136_v7 = vld [vmem:[#allocation4 + $0x20] sm:$0xff]  ;;  %vm381_vm7 = vcmask 15368   ;;  %vm384_vm8 = vcmask 23568   ;;  %vm387_vm9 = vcmask 64536  }
  0x27   :  { %442 = vmatprep.mubr.msk.f32.mxu0 %vm45_vm0, %v708_v2  ;;  %v134_v4 = vld [vmem:[#allocation4 + $0x10] sm:$0xff]  ;;  %v137_v8 = vld [vmem:[#allocation4 + $0x28] sm:$0xff]  ;;  %v139_v11 = vld [vmem:[#allocation4 + $0x38] sm:$0xff]  ;;  %v716_v47 = vand.u32 127, %v129_v46 }
  0x28   :  { %v519_v6 = vpack.c.bf16 %v135_v5, %v134_v4  ;;  %516 = vmatprep.subr.bf16.mxu0 %v515_v3  ;;  %v523_v9 = vpack.c.bf16 %v137_v8, %v136_v7  ;;  %v138_v10 = vld [vmem:[#allocation4 + $0x30] sm:$0xff]  ;;  %v712_v12 = vld [vmem:[#allocation2 + $0x8] sm:$0xff]  ;;  %v140_v14 = vld [vmem:[#allocation4 + $0x40] sm:$0xff]  ;;  %v583_v4 = vtrunc.f32 %v708_v2  ;;  %v667_v7 = vmov 4  }
  0x29   :  { %518 = vmatpush3.bf16.msra.mxu0 %v515_v3  ;;  %v527_v13 = vpack.c.bf16 %v139_v11, %v138_v10  ;;  %v141_v15 = vld [vmem:[#allocation4 + $0x48] sm:$0xff]  ;;  %v142_v17 = vld [vmem:[#allocation4 + $0x50] sm:$0xff]  ;;  %v143_v18 = vld [vmem:[#allocation4 + $0x58] sm:$0xff]  ;;  %vm131_vm1 = vcmp.eq.s32.totalorder %v716_v47, 64  ;;  %593 = vset.pattern.permute.xlu1 %v667_v7  ;;  %vm320_vm2 = vcmp.lt.s32.totalorder %v716_v47, 4  ;;  %vm371_vm5 = vcmp.eq.s32.totalorder %v716_v47, 4 }
  0x2a   :  { %520 = vmatprep.subr.bf16.mxu1 %v519_v6  ;;  %v531_v16 = vpack.c.bf16 %v141_v15, %v140_v14  ;;  %v535_v19 = vpack.c.bf16 %v143_v18, %v142_v17  ;;  %v144_v20 = vld [vmem:[#allocation4 + $0x60] sm:$0xff]  ;;  %v145_v21 = vld [vmem:[#allocation4 + $0x68] sm:$0xff]  ;;  %v146_v23 = vld [vmem:[#allocation4 + $0x70] sm:$0xff]  ;;  %v584_v5 = vcvt.f32.s32 %v583_v4  ;;  %594 = vset.pattern.permute.xlu0 %v667_v7 }
  0x2b   :  { %522 = vmatpush3.bf16.msra.mxu1 %v519_v6  ;;  %v539_v22 = vpack.c.bf16 %v145_v21, %v144_v20  ;;  %v147_v24 = vld [vmem:[#allocation4 + $0x78] sm:$0xff]  ;;  %v148_v25 = vld [vmem:[#allocation4 + $0x80] sm:$0xff]  ;;  %v149_v27 = vld [vmem:[#allocation4 + $0x88] sm:$0xff]  ;;  %v585_v6 = vtrunc.f32 %v712_v12 }
  0x2c   :  { %524 = vmatprep.subr.bf16.mxu1 %v523_v9  ;;  %443 = vmatmul.mubr.msk.f32.vlgmr.msra.gmra.mrb[0].mxu0 %vm45_vm0, %v712_v12  ;;  %v543_v26 = vpack.c.bf16 %v147_v24, %v146_v23  ;;  %v547_v28 = vpack.c.bf16 %v149_v27, %v148_v25  ;;  %v229_v29 = vld [vmem:[#allocation4 + $0x90] sm:$0xff]  ;;  %v230_v30 = vld [vmem:[#allocation4 + $0x98] sm:$0xff]  ;;  %v231_v31 = vld [vmem:[#allocation4 + $0xa0] sm:$0xff] }
  0x2d   :  { %v551_v32 = vpack.c.bf16 %v230_v30, %v229_v29  ;;  %v232_v33 = vld [vmem:[#allocation4 + $0xa8] sm:$0xff]  ;;  %v233_v35 = vld [vmem:[#allocation4 + $0xb0] sm:$0xff]  ;;  %v234_v36 = vld [vmem:[#allocation4 + $0xb8] sm:$0xff]  ;;  %344 = vperm.xlu1 %593, %v584_v5   ;;  %v586_v8 = vcvt.f32.s32 %v585_v6 }
  0x2e   :  { %v555_v34 = vpack.c.bf16 %v232_v33, %v231_v31  ;;  %v559_v37 = vpack.c.bf16 %v234_v36, %v233_v35  ;;  %v235_v38 = vld [vmem:[#allocation4 + $0xc0] sm:$0xff]  ;;  %v236_v39 = vld [vmem:[#allocation4 + $0xc8] sm:$0xff]  ;;  %v237_v41 = vld [vmem:[#allocation4 + $0xd0] sm:$0xff] }
  0x2f   :  { %526 = vmatpush3.bf16.msra.mxu1 %v523_v9  ;;  %552 = vmatprep.subr.bf16.mxu0 %v551_v32  ;;  %v563_v40 = vpack.c.bf16 %v236_v39, %v235_v38  ;;  %v238_v42 = vld [vmem:[#allocation4 + $0xd8] sm:$0xff]  ;;  %v239_v52 = vld [vmem:[#allocation4 + $0xe0] sm:$0xff]  ;;  %v240_v53 = vld [vmem:[#allocation4 + $0xe8] sm:$0xff] }
  0x30   :  { %528 = vmatprep.subr.bf16.mxu1 %v527_v13  ;;  %554 = vmatpush3.bf16.msra.mxu0 %v551_v32  ;;  %v567_v43 = vpack.c.bf16 %v238_v42, %v237_v41  ;;  %v571_v54 = vpack.c.bf16 %v240_v53, %v239_v52  ;;  %v241_v55 = vld [vmem:[#allocation4 + $0xf0] sm:$0xff]  ;;  %v242_v56 = vld [vmem:[#allocation4 + $0xf8] sm:$0xff]  ;;  %v243_v57 = vld [vmem:[#allocation4 + $0x100] sm:$0xff] }
  0x31   :  { %556 = vmatprep.subr.bf16.mxu0 %v555_v34  ;;  %v575_v58 = vpack.c.bf16 %v242_v56, %v241_v55  ;;  %v244_v59 = vld [vmem:[#allocation4 + $0x108] sm:$0xff]  ;;  %347 = vperm.xlu1 %593, %v586_v8  }
  0x32   :  { %v579_v60 = vpack.c.bf16 %v244_v59, %v243_v57 }
  0x33   :  { %530 = vmatpush3.bf16.msra.mxu1 %v527_v13 }
  0x34   :  { %532 = vmatprep.subr.bf16.mxu1 %v531_v16  ;;  %558 = vmatpush3.bf16.msra.mxu0 %v555_v34 }
  0x35   :  { %560 = vmatprep.subr.bf16.mxu0 %v559_v37 }
  0x37   :  { %534 = vmatpush3.bf16.msra.mxu1 %v531_v16 }
  0x38   :  { %536 = vmatprep.subr.bf16.mxu1 %v535_v19  ;;  %562 = vmatpush3.bf16.msra.mxu0 %v559_v37 }
  0x39   :  { %564 = vmatprep.subr.bf16.mxu0 %v563_v40 }
  0x3b   :  { %538 = vmatpush3.bf16.msra.mxu1 %v535_v19 }
  0x3c   :  { %540 = vmatprep.subr.bf16.mxu1 %v539_v22  ;;  %566 = vmatpush3.bf16.msra.mxu0 %v563_v40 }
  0x3d   :  { %568 = vmatprep.subr.bf16.mxu0 %v567_v43 }
  0x3f   :  { %542 = vmatpush3.bf16.msra.mxu1 %v539_v22 }
  0x40   :  { %544 = vmatprep.subr.bf16.mxu1 %v543_v26  ;;  %570 = vmatpush3.bf16.msra.mxu0 %v567_v43 }
  0x41   :  { %572 = vmatprep.subr.bf16.mxu0 %v571_v54 }
  0x43   :  { %546 = vmatpush3.bf16.msra.mxu1 %v543_v26 }
  0x44   :  { %548 = vmatprep.subr.bf16.mxu1 %v547_v28  ;;  %574 = vmatpush3.bf16.msra.mxu0 %v571_v54 }
  0x45   :  { %576 = vmatprep.subr.bf16.mxu0 %v575_v58 }
  0x47   :  { %550 = vmatpush3.bf16.msra.mxu1 %v547_v28 }
  0x48   :  { %578 = vmatpush3.bf16.msra.mxu0 %v575_v58 }
  0x49   :  { %580 = vmatprep.subr.bf16.mxu0 %v579_v60 }
  0x4c   :  { %582 = vmatpush3.bf16.msra.mxu0 %v579_v60 }
  0xac   :  { %v345_v13 = vpop.permute.xlu1 %344 }
  0xad   :  { %vm349_vm3 = vcmp.eq.s32.totalorder %v716_v47, %v345_v13 }
  0xb0   :  { %v348_v15 = vpop.permute.xlu1 %347 }
  0xb1   :  { %vm350_vm4 = vcmp.eq.s32.totalorder %v716_v47, %v348_v15 }
  0xff   :  { %v444_v44 = vpop.f32.mrb[0].mxu0 }
 0x100   :  { %595 = vtanh.f32 %v444_v44  ;;  %v118_v45 = vpop.f32.mrb[1].mxu0 }
 0x101   :  { %597 = vtanh.f32 %v118_v45 }
 0x10a   :  { %v596_v48 = vpop.eup %595 }
 0x10b   :  { %v598_v49 = vpop.eup %597  ;;  %v133_v51 = vsel %vm131_vm1, 1.0, %v596_v48  ;;  %v668_v48 = vmov 0.0  }
 0x10c   :  { %v132_v50 = vsel %vm131_vm1, 1.0, %v598_v49 }
 0x10d   :  { %477 = vmatprep.mubr.f32.mxu1 %v132_v50 }
 0x10e   :  { %478 = vmatmul.mubr.f32.vlgmr.msra.gmra.mrb[0].mxu1 %v133_v51 }
 0x1e1   :  { %v479_v61 = vpop.f32.mrb[0].mxu1 }
 0x1e2   :  { %599 = vtanh.f32 %v479_v61  ;;  %v216_v62 = vpop.f32.mrb[1].mxu1 }
 0x1e3   :  { %601 = vtanh.f32 %v216_v62 }
 0x1ec   :  { %v600_v63 = vpop.eup %599 }
 0x1ed   :  { %v602_v0 = vpop.eup %601  ;;  %v228_v3 = vsel %vm131_vm1, 1.0, %v600_v63 }
 0x1ee   :  { %v227_v1 = vsel %vm131_vm1, 1.0, %v602_v0 }
 0x1ef   :  { %512 = vmatprep.mubr.f32.mxu0 %v227_v1 }
 0x1f0   :  { %513 = vmatmul.mubr.f32.vlgmr.msra.gmra.mrb[2].mxu0 %v228_v3 }
 0x2c3   :  { %v514_v9 = vpop.f32.mrb[2].mxu0 }
 0x2c4   :  { %v311_v10 = vpop.f32.mrb[3].mxu0  ;;  %v322_v2 = vsel %vm320_vm2, %v514_v9, -1e+30  ;;  %v373_v29 = vsel %vm371_vm5, %v514_v9, 0.0 }
 0x2c5   :  { %v321_v11 = vsel %vm320_vm2, %v311_v10, -1e+30  ;;  %v372_v26 = vsel %vm371_vm5, %v311_v10, 0.0 }
 0x2c6   :  { %323 = vmax.xlane.f32.xlu0 %v321_v11 }
 0x2ca   :  { %325 = vmax.xlane.f32.xlu0 %v322_v2 }
 0x353   :  { %v324_v12 = vpop.xlane.xlu0 %323 }
 0x354   :  { %v327_v14 = vsub.f32 %v321_v11, %v324_v12 }
 0x356   :  { %v329_v16 = vmul.f32 1.442695, %v327_v14  ;;  %v351_v17 = vsel %vm349_vm3, %v327_v14, 0.0 }
 0x357   :  { %v326_v18 = vpop.xlane.xlu0 %325  ;;  %353 = vadd.xlane.f32.xlu0 %v351_v17 }
 0x358   :  { %603 = vpow2.f32 %v329_v16  ;;  %v328_v19 = vsub.f32 %v322_v2, %v326_v18 }
 0x35a   :  { %v331_v20 = vmul.f32 1.442695, %v328_v19  ;;  %v352_v21 = vsel %vm350_vm4, %v328_v19, 0.0 }
 0x35b   :  { %355 = vadd.xlane.f32.xlu0 %v352_v21 }
 0x35c   :  { %605 = vpow2.f32 %v331_v20 }
 0x362   :  { %v604_v22 = vpop.eup %603 }
 0x363   :  { %v333_v23 = vsel %vm320_vm2, %v604_v22, 0.0 }
 0x364   :  { %335 = vadd.xlane.f32.xlu0 %v333_v23  ;;  %v359_v28 = vmul.f32 %v333_v23, %v327_v14 }
 0x366   :  { %v606_v24 = vpop.eup %605 }
 0x367   :  { %v334_v25 = vsel %vm320_vm2, %v606_v24, 0.0 }
 0x368   :  { %337 = vadd.xlane.f32.xlu1 %v334_v25  ;;  %374 = vadd.xlane.f32.xlu0 %v372_v26  ;;  %v360_v27 = vmul.f32 %v334_v25, %v328_v19 }
 0x36c   :  { %363 = vadd.xlane.f32.xlu0 %v360_v27 }
 0x370   :  { %361 = vadd.xlane.f32.xlu0 %v359_v28 }
 0x374   :  { %376 = vadd.xlane.f32.xlu0 %v373_v29 }
 0x3e4   :  { %v354_v30 = vpop.xlane.xlu0 %353 }
 0x3e8   :  { %v356_v31 = vpop.xlane.xlu0 %355 }
 0x3f1   :  { %v336_v32 = vpop.xlane.xlu0 %335 }
 0x3f2   :  { %607 = vlog2.f32 %v336_v32 }
 0x3f3   :  { %609 = vrcp.f32 %v336_v32 }
 0x3f5   :  { %v375_v33 = vpop.xlane.xlu0 %374  ;;  %v338_v34 = vpop.xlane.xlu1 %337 }
 0x3f6   :  { %611 = vlog2.f32 %v338_v34 }
 0x3f7   :  { %613 = vrcp.f32 %v338_v34 }
 0x3f9   :  { %v364_v35 = vpop.xlane.xlu0 %363 }
 0x3fc   :  { %v608_v36 = vpop.eup %607 }
 0x3fd   :  { %v610_v37 = vpop.eup %609  ;;  %v340_v38 = vmul.f32 0.6931472, %v608_v36  ;;  %v362_v39 = vpop.xlane.xlu0 %361 }
 0x3fe   :  { %v366_v40 = vmul.f32 %v610_v37, %v362_v39 }
 0x3ff   :  { %v357_v41 = vsub.f32 %v354_v30, %v340_v38 }
 0x400   :  { %v612_v42 = vpop.eup %611  ;;  %v369_v43 = vsub.f32 %v340_v38, %v366_v40 }
 0x401   :  { %v614_v44 = vpop.eup %613  ;;  %379 = vst.msk [vmem:[%s773_s2] sm:$0xff] %vm378_vm6, %v357_v41  ;;  %v342_v45 = vmul.f32 0.6931472, %v612_v42  ;;  %v377_v50 = vpop.xlane.xlu0 %376 }
 0x402   :  { %382 = vst.msk [vmem:[%s773_s2] sm:$0xff] %vm381_vm7, %v375_v33  ;;  %v368_v46 = vmul.f32 %v614_v44, %v364_v35 }
 0x403   :  { %v358_v47 = vsub.f32 %v356_v31, %v342_v45  ;;  %385 = vst.msk [vmem:[%s773_s2] sm:$0xff] %vm384_vm8, %v369_v43 }
 0x404   :  { %388 = vst.msk [vmem:[%s773_s2] sm:$0xff] %vm387_vm9, %v668_v48  ;;  %v370_v49 = vsub.f32 %v342_v45, %v368_v46 }
 0x405   :  { %380 = vst.msk [vmem:[%s773_s2 + $0x8] sm:$0xff] %vm378_vm6, %v358_v47 }
 0x406   :  { %383 = vst.msk [vmem:[%s773_s2 + $0x8] sm:$0xff] %vm381_vm7, %v377_v50 }
 0x407   :  { %386 = vst.msk [vmem:[%s773_s2 + $0x8] sm:$0xff] %vm384_vm8, %v370_v49 }
 0x408   :  { %389 = vst.msk [vmem:[%s773_s2 + $0x8] sm:$0xff] %vm387_vm9, %v668_v48 }
 0x409   :  { %394 = vsyncpa [#allocation3], 1 }
 0x40a   :  { %395 = vsyncpa [#allocation5], 1 }

</bundles_post_ra>
